<compile_context>
chip_gen: v5e
topology: v5e:2x2
jax: 0.10.0
libtpu: 0.0.40
codegen_flags: <defaults>
</compile_context>

<pallas_src>
import jax
import jax.numpy as jnp
from jax.experimental import pallas as pl
from jax.experimental.pallas import tpu as pltpu

LRELU_SLOPE = 0.2      # negative slope of the 'lrelu' activation
H1, H2 = 512, 256      # hidden sizes of the MLP


def _round_up(x, m):
    return ((x + m - 1) // m) * m


def _resident_spec(block_shape, index_map):
    """BlockSpec for a VMEM-resident (constant index_map) operand.

    Requests single buffering (the second pipeline buffer of a never-changing
    block is dead VMEM) when the installed jax supports `pipeline_mode`.
    """
    try:
        return pl.BlockSpec(block_shape, index_map, pipeline_mode=pl.Buffered(1))
    except Exception:
        return pl.BlockSpec(block_shape, index_map)


# ---------------------------------------------------------------------------
# Kernels
# ---------------------------------------------------------------------------
def _make_resident_kernel(residual):
    """W3/b3 VMEM-resident; 1-D grid over batch tiles; no scratch carry."""

    def kernel(code_ref, w1_ref, b1_ref, w2_ref, b2_ref, w3_ref, b3_ref, *rest):
        if residual:
            tmpl_ref, out_ref = rest
        else:
            (out_ref,) = rest
        cdt = w1_ref.dtype
        h = jnp.dot(code_ref[...].astype(cdt), w1_ref[...],
                    preferred_element_type=jnp.float32)
        h = h + b1_ref[...]
        h = jnp.maximum(h, LRELU_SLOPE * h)          # LeakyReLU(0.2) in f32 (VPU)
        h = jnp.dot(h.astype(cdt), w2_ref[...],
                    preferred_element_type=jnp.float32)
        h = h + b2_ref[...]
        h = jnp.maximum(h, LRELU_SLOPE * h)
        x = jnp.dot(h.astype(cdt), w3_ref[...],
                    preferred_element_type=jnp.float32)
        x = x + b3_ref[...]
        if residual:
            x = x + tmpl_ref[...].astype(jnp.float32)
        out_ref[...] = x

    return kernel


def _make_tiled_kernel(residual):
    """Column-tiled W3 (huge npoint*dim): layers 1-2 computed once per batch
    tile (first column step) and cached in VMEM scratch.  Correct only because
    the column axis is the innermost, in-order, 'arbitrary' grid axis."""

    def kernel(code_ref, w1_ref, b1_ref, w2_ref, b2_ref, w3_ref, b3_ref, *rest):
        if residual:
            tmpl_ref, out_ref, h_ref = rest
        else:
            out_ref, h_ref = rest
        cdt = w1_ref.dtype

        @pl.when(pl.program_id(1) == 0)
        def _():
            h = jnp.dot(code_ref[...].astype(cdt), w1_ref[...],
                        preferred_element_type=jnp.float32)
            h = h + b1_ref[...]
            h = jnp.maximum(h, LRELU_SLOPE * h)
            h = jnp.dot(h.astype(cdt), w2_ref[...],
                        preferred_element_type=jnp.float32)
            h = h + b2_ref[...]
            h_ref[...] = jnp.maximum(h, LRELU_SLOPE * h)

        x = jnp.dot(h_ref[...].astype(cdt), w3_ref[...],
                    preferred_element_type=jnp.float32)
        x = x + b3_ref[...]
        if residual:
            x = x + tmpl_ref[...].astype(jnp.float32)
        out_ref[...] = x

    return kernel


# ---------------------------------------------------------------------------
# Parameters
# ---------------------------------------------------------------------------
def init_params(key, bottleneck_size, npoint, dim, dtype=jnp.float32):
    """nn.Linear-style init (uniform +/- 1/sqrt(fan_in)).
    Weights stored as (in, out) = torch_weight.T; biases as (1, out)."""
    sizes = [(bottleneck_size, H1), (H1, H2), (H2, npoint * dim)]
    params = {}
    for i, (fin, fout) in enumerate(sizes, start=1):
        key, kw, kb = jax.random.split(key, 3)
        bound = 1.0 / (fin ** 0.5)
        params[f"w{i}"] = jax.random.uniform(kw, (fin, fout), dtype, -bound, bound)
        params[f"b{i}"] = jax.random.uniform(kb, (1, fout), dtype, -bound, bound)
    return params


def prepare_params(params, compute_dtype=jnp.bfloat16):
    """One-time parameter prep, hoisted out of the per-call forward.

    Matmul-operand weights are cast to `compute_dtype` once (bf16 default: the
    kernel is HBM-bound on the W3 stream, so halving its bytes roughly halves
    wall clock); biases stay f32 (added to f32 accumulators).  Accumulation and
    LeakyReLU math are always f32 inside the kernel.
    """
    cdt = jnp.dtype(compute_dtype)
    return {
        "w1": params["w1"].astype(cdt),
        "w2": params["w2"].astype(cdt),
        "w3": params["w3"].astype(cdt),
        "b1": params["b1"].astype(jnp.float32),
        "b2": params["b2"].astype(jnp.float32),
        "b3": params["b3"].astype(jnp.float32),
    }


# ---------------------------------------------------------------------------
# Tiling selection
# ---------------------------------------------------------------------------
def _select_tiling(B, bottleneck, CN, witem, in_item, t_item, residual, budget):
    """Returns (w3_resident, TM, TN, vmem_estimate).  Estimates assume
    double-buffering everywhere (conservative; Buffered(1) residents only free
    additional VMEM)."""
    small_res = 2 * ((bottleneck * H1 + H1 * H2) * witem + (H1 + H2) * 4)
    w3_res = 2 * (H2 * CN * witem + CN * 4)
    TM_max = min(512, _round_up(B, 8))

    # Path A: W3/b3 VMEM-resident -> streamed from HBM exactly once;
    # 1-D "parallel" grid over batch tiles.
    per_row = 2 * (bottleneck * in_item
                   + (CN * t_item if residual else 0) + CN * 4)
    if small_res + w3_res + 8 * per_row <= budget:
        TM = TM_max
        while TM > 8 and small_res + w3_res + TM * per_row > budget:
            TM -= 8
        return True, TM, CN, small_res + w3_res + TM * per_row

    # Path B: column-tiled W3.  Large TM/TN amortize per-step overhead and cut
    # the number of full-W3 re-streams; sized against the VMEM budget.
    TM = TM_max
    need = 0
    while True:
        for tn in (2048, 1024, 512, 256, 128):
            TN = min(tn, _round_up(CN, 128))
            per_step = 2 * (TM * bottleneck * in_item + H2 * TN * witem + TN * 4
                            + (TM * TN * t_item if residual else 0)
                            + TM * TN * 4)
            need = small_res + per_step + TM * H2 * 4
            if need <= budget:
                return False, TM, TN, need
        if TM <= 8:
            return False, 8, 128, need
        TM = max(8, (TM // 2) // 8 * 8)


# ---------------------------------------------------------------------------
# Forward
# ---------------------------------------------------------------------------
def mlp_deformer(code, template, params, residual=True):
    """code: (B, bottleneck) (higher rank is flattened); template: (B, dim, npoint).
    `params`: output of prepare_params() (or raw f32 params from init_params)."""
    B, C, N = template.shape
    if code.ndim > 2:
        code = code.reshape(B, -1)
    bottleneck = code.shape[1]
    CN = C * N

    w1, b1 = params["w1"], params["b1"]
    w2, b2 = params["w2"], params["b2"]
    w3, b3 = params["w3"], params["b3"]
    witem = w1.dtype.itemsize
    in_item = code.dtype.itemsize
    t_item = template.dtype.itemsize

    try:
        phys_vmem = int(pltpu.get_tpu_info().vmem_capacity_bytes)
    except Exception:
        phys_vmem = 64 * 2 ** 20              # conservative: v7x per-core VMEM
    budget = int(0.6 * phys_vmem)             # tile-sizing budget

    w3_resident, TM, TN, vmem_est = _select_tiling(
        B, bottleneck, CN, witem, in_item, t_item, residual, budget)
    vmem_limit = int(min(max(int(1.25 * vmem_est) + (4 << 20), 16 << 20),
                         int(0.75 * phys_vmem)))

    n_btiles = pl.cdiv(B, TM)
    if w3_resident:
        grid = (n_btiles,)
        dims = ("parallel",)
        res = lambda i: (0, 0)
        in_specs = [
            pl.BlockSpec((TM, bottleneck), lambda i: (i, 0)),   # code (M-tiled)
            _resident_spec((bottleneck, H1), res),              # w1
            _resident_spec((1, H1), res),                       # b1
            _resident_spec((H1, H2), res),                      # w2
            _resident_spec((1, H2), res),                       # b2
            _resident_spec((H2, CN), res),                      # w3 (resident)
            _resident_spec((1, CN), res),                       # b3
        ]
        data_spec = pl.BlockSpec((TM, CN), lambda i: (i, 0))    # template / out
        scratch = []
        kernel = _make_resident_kernel(residual)
        w3_reads = 1
    else:
        grid = (n_btiles, pl.cdiv(CN, TN))
        # Column axis carries the hidden-activation scratch -> it must stay the
        # innermost, in-order, "arbitrary" axis (never mark it parallel).
        dims = ("parallel", "arbitrary")
        res = lambda i, j: (0, 0)
        in_specs = [
            pl.BlockSpec((TM, bottleneck), lambda i, j: (i, 0)),
            _resident_spec((bottleneck, H1), res),
            _resident_spec((1, H1), res),
            _resident_spec((H1, H2), res),
            _resident_spec((1, H2), res),
            pl.BlockSpec((H2, TN), lambda i, j: (0, j)),        # w3 (col-tiled)
            pl.BlockSpec((1, TN), lambda i, j: (0, j)),         # b3
        ]
        data_spec = pl.BlockSpec((TM, TN), lambda i, j: (i, j))
        scratch = [pltpu.VMEM((TM, H2), jnp.float32)]
        kernel = _make_tiled_kernel(residual)
        w3_reads = n_btiles

    args = [code, w1, b1, w2, b2, w3, b3]
    if residual:
        in_specs.append(data_spec)
        args.append(template.reshape(B, CN))    # contiguous reshape, no copy

    flops = 2 * B * (bottleneck * H1 + H1 * H2 + H2 * CN)
    bytes_accessed = (code.size * in_item
                      + (bottleneck * H1 + H1 * H2) * witem + (H1 + H2) * 4
                      + w3_reads * (H2 * CN * witem + CN * 4)
                      + (B * CN * t_item if residual else 0)
                      + B * CN * 4)

    out2d = pl.pallas_call(
        kernel,
        out_shape=jax.ShapeDtypeStruct((B, CN), jnp.float32),
        grid=grid,
        in_specs=in_specs,
        out_specs=data_spec,
        scratch_shapes=scratch,
        compiler_params=pltpu.CompilerParams(
            dimension_semantics=dims,
            vmem_limit_bytes=vmem_limit),
        cost_estimate=pl.CostEstimate(flops=int(flops), transcendentals=0,
                                      bytes_accessed=int(bytes_accessed)),
    )(*args)

    return out2d.reshape(B, C, N)


# ---------------------------------------------------------------------------
# Pure-JAX reference (mirrors the kernel's dtype handling)
# ---------------------------------------------------------------------------
def _reference(code, template, params, residual=True):
    f32 = jnp.float32
    B, C, N = template.shape
    if code.ndim > 2:
        code = code.reshape(B, -1)
    cdt = params["w1"].dtype
    h = jnp.dot(code.astype(cdt), params["w1"], preferred_element_type=f32)
    h = h + params["b1"].astype(f32)
    h = jnp.maximum(h, LRELU_SLOPE * h)
    h = jnp.dot(h.astype(cdt), params["w2"], preferred_element_type=f32)
    h = h + params["b2"].astype(f32)
    h = jnp.maximum(h, LRELU_SLOPE * h)
    x = jnp.dot(h.astype(cdt), params["w3"], preferred_element_type=f32)
    x = x + params["b3"].astype(f32)
    x = x.reshape(B, C, N)
    if residual:
        x = x + template.astype(f32)
    return x


if __name__ == "__main__":
    key = jax.random.PRNGKey(0)

    def run_case(seed, B, dim, npoint, bottleneck, residual, compute_dtype, tol):
        k = jax.random.fold_in(key, seed)
        kc, kt, kp = jax.random.split(k, 3)
        code = jax.random.normal(kc, (B, bottleneck), jnp.float32)
        template = jax.random.normal(kt, (B, dim, npoint), jnp.float32)
        raw = init_params(kp, bottleneck, npoint, dim)
        params = prepare_params(raw, compute_dtype=compute_dtype)  # one-time prep
        out = mlp_deformer(code, template, params, residual=residual)
        out = jax.block_until_ready(out)
        ref = _reference(code, template, params, residual=residual)
        assert out.shape == (B, dim, npoint)
        assert out.dtype == jnp.float32
        err = float(jnp.max(jnp.abs(out - ref)))
        assert jnp.allclose(out, ref, atol=tol, rtol=tol), \
            f"case seed={seed}: mismatch vs reference (max abs err {err})"

    # f32 operands, residual, lane-aligned output (npoint*dim = 512)
    run_case(0, B=2, dim=4, npoint=128, bottleneck=32,
             residual=True, compute_dtype=jnp.float32, tol=1e-2)
    # bf16 matmul operands (default prep), f32 accumulation, residual
    run_case(1, B=2, dim=4, npoint=128, bottleneck=32,
             residual=True, compute_dtype=jnp.bfloat16, tol=5e-2)
    # f32, residual=False (no template streamed), non-128-aligned npoint*dim,
    # ragged batch (B=5 < sublane tile)
    run_case(2, B=5, dim=3, npoint=100, bottleneck=32,
             residual=False, compute_dtype=jnp.float32, tol=1e-2)

    print("KERNEL_OK")
</pallas_src>

<mosaic_0001>
module attributes {stable_mosaic.version = 11 : i64} {
  func.func @kernel(%arg0: i32, %arg1: memref<8x32xf32, #tpu.memory_space<vmem>>, %arg2: memref<32x512xf32, #tpu.memory_space<vmem>>, %arg3: memref<1x512xf32, #tpu.memory_space<vmem>>, %arg4: memref<512x256xf32, #tpu.memory_space<vmem>>, %arg5: memref<1x256xf32, #tpu.memory_space<vmem>>, %arg6: memref<256x512xf32, #tpu.memory_space<vmem>>, %arg7: memref<1x512xf32, #tpu.memory_space<vmem>>, %arg8: memref<8x512xf32, #tpu.memory_space<vmem>>, %arg9: memref<8x512xf32, #tpu.memory_space<vmem>>) attributes {dimension_semantics = [#tpu.dimension_semantics<parallel>], iteration_bounds = array<i64: 1>, scalar_prefetch = 0 : i64, scratch_operands = 0 : i64, tpu.core_type = #tpu.core_type<tc>, window_params = [{transform_indices = @transform_0, window_bounds = array<i64: 8, 32>}, {pipeline_mode = #tpu.pipeline_mode<synchronous>, transform_indices = @transform_1, window_bounds = array<i64: 32, 512>}, {pipeline_mode = #tpu.pipeline_mode<synchronous>, transform_indices = @transform_2, window_bounds = array<i64: 1, 512>}, {pipeline_mode = #tpu.pipeline_mode<synchronous>, transform_indices = @transform_3, window_bounds = array<i64: 512, 256>}, {pipeline_mode = #tpu.pipeline_mode<synchronous>, transform_indices = @transform_4, window_bounds = array<i64: 1, 256>}, {pipeline_mode = #tpu.pipeline_mode<synchronous>, transform_indices = @transform_5, window_bounds = array<i64: 256, 512>}, {pipeline_mode = #tpu.pipeline_mode<synchronous>, transform_indices = @transform_6, window_bounds = array<i64: 1, 512>}, {transform_indices = @transform_7, window_bounds = array<i64: 8, 512>}, {transform_indices = @transform_8, window_bounds = array<i64: 8, 512>}]} {
    %c0 = arith.constant 0 : index
    %c0_0 = arith.constant 0 : index
    %0 = vector.load %arg1[%c0, %c0_0] : memref<8x32xf32, #tpu.memory_space<vmem>>, vector<8x32xf32>
    %c0_1 = arith.constant 0 : index
    %c0_2 = arith.constant 0 : index
    %1 = vector.load %arg2[%c0_1, %c0_2] : memref<32x512xf32, #tpu.memory_space<vmem>>, vector<32x512xf32>
    %cst = arith.constant dense<0.000000e+00> : vector<8x512xf32>
    %2 = tpu.matmul %0, %1, %cst {dimension_numbers = #tpu.dot_dimension_numbers<[1], [0], [0], [1], [0, 0, 1, 1], [], []>} : vector<8x32xf32>, vector<32x512xf32>, vector<8x512xf32> -> vector<8x512xf32>
    %c0_3 = arith.constant 0 : index
    %c0_4 = arith.constant 0 : index
    %3 = vector.load %arg3[%c0_3, %c0_4] : memref<1x512xf32, #tpu.memory_space<vmem>>, vector<1x512xf32>
    %4 = vector.broadcast %3 : vector<1x512xf32> to vector<8x512xf32>
    %5 = arith.addf %2, %4 : vector<8x512xf32>
    %cst_5 = arith.constant 2.000000e-01 : f32
    %6 = vector.broadcast %cst_5 : f32 to vector<8x512xf32>
    %7 = arith.mulf %6, %5 : vector<8x512xf32>
    %8 = arith.maximumf %5, %7 : vector<8x512xf32>
    %c0_6 = arith.constant 0 : index
    %c0_7 = arith.constant 0 : index
    %9 = vector.load %arg4[%c0_6, %c0_7] : memref<512x256xf32, #tpu.memory_space<vmem>>, vector<512x256xf32>
    %cst_8 = arith.constant dense<0.000000e+00> : vector<8x256xf32>
    %10 = tpu.matmul %8, %9, %cst_8 {dimension_numbers = #tpu.dot_dimension_numbers<[1], [0], [0], [1], [0, 0, 1, 1], [], []>} : vector<8x512xf32>, vector<512x256xf32>, vector<8x256xf32> -> vector<8x256xf32>
    %c0_9 = arith.constant 0 : index
    %c0_10 = arith.constant 0 : index
    %11 = vector.load %arg5[%c0_9, %c0_10] : memref<1x256xf32, #tpu.memory_space<vmem>>, vector<1x256xf32>
    %12 = vector.broadcast %11 : vector<1x256xf32> to vector<8x256xf32>
    %13 = arith.addf %10, %12 : vector<8x256xf32>
    %cst_11 = arith.constant 2.000000e-01 : f32
    %14 = vector.broadcast %cst_11 : f32 to vector<8x256xf32>
    %15 = arith.mulf %14, %13 : vector<8x256xf32>
    %16 = arith.maximumf %13, %15 : vector<8x256xf32>
    %c0_12 = arith.constant 0 : index
    %c0_13 = arith.constant 0 : index
    %17 = vector.load %arg6[%c0_12, %c0_13] : memref<256x512xf32, #tpu.memory_space<vmem>>, vector<256x512xf32>
    %cst_14 = arith.constant dense<0.000000e+00> : vector<8x512xf32>
    %18 = tpu.matmul %16, %17, %cst_14 {dimension_numbers = #tpu.dot_dimension_numbers<[1], [0], [0], [1], [0, 0, 1, 1], [], []>} : vector<8x256xf32>, vector<256x512xf32>, vector<8x512xf32> -> vector<8x512xf32>
    %c0_15 = arith.constant 0 : index
    %c0_16 = arith.constant 0 : index
    %19 = vector.load %arg7[%c0_15, %c0_16] : memref<1x512xf32, #tpu.memory_space<vmem>>, vector<1x512xf32>
    %20 = vector.broadcast %19 : vector<1x512xf32> to vector<8x512xf32>
    %21 = arith.addf %18, %20 : vector<8x512xf32>
    %c0_17 = arith.constant 0 : index
    %c0_18 = arith.constant 0 : index
    %22 = vector.load %arg8[%c0_17, %c0_18] : memref<8x512xf32, #tpu.memory_space<vmem>>, vector<8x512xf32>
    %23 = arith.addf %21, %22 : vector<8x512xf32>
    %c0_19 = arith.constant 0 : index
    %c0_20 = arith.constant 0 : index
    %24 = vector.load %arg9[%c0_19, %c0_20] : memref<8x512xf32, #tpu.memory_space<vmem>>, vector<8x512xf32>
    tpu.vector_store %arg9[%c0_19, %c0_20], %23 {strides = array<i32>} : memref<8x512xf32, #tpu.memory_space<vmem>>, vector<8x512xf32>,
    return
  }
  func.func @transform_0(%arg0: i32) -> (i32, i32) {
    %c0_i32 = arith.constant 0 : i32
    %c0_i32_0 = arith.constant 0 : i32
    return %arg0, %c0_i32 : i32, i32
  }
  func.func @transform_1(%arg0: i32) -> (i32, i32) {
    %c0_i32 = arith.constant 0 : i32
    %c0_i32_0 = arith.constant 0 : i32
    %c0_i32_1 = arith.constant 0 : i32
    return %c0_i32, %c0_i32_0 : i32, i32
  }
  func.func @transform_2(%arg0: i32) -> (i32, i32) {
    %c0_i32 = arith.constant 0 : i32
    %c0_i32_0 = arith.constant 0 : i32
    %c0_i32_1 = arith.constant 0 : i32
    return %c0_i32, %c0_i32_0 : i32, i32
  }
  func.func @transform_3(%arg0: i32) -> (i32, i32) {
    %c0_i32 = arith.constant 0 : i32
    %c0_i32_0 = arith.constant 0 : i32
    %c0_i32_1 = arith.constant 0 : i32
    return %c0_i32, %c0_i32_0 : i32, i32
  }
  func.func @transform_4(%arg0: i32) -> (i32, i32) {
    %c0_i32 = arith.constant 0 : i32
    %c0_i32_0 = arith.constant 0 : i32
    %c0_i32_1 = arith.constant 0 : i32
    return %c0_i32, %c0_i32_0 : i32, i32
  }
  func.func @transform_5(%arg0: i32) -> (i32, i32) {
    %c0_i32 = arith.constant 0 : i32
    %c0_i32_0 = arith.constant 0 : i32
    %c0_i32_1 = arith.constant 0 : i32
    return %c0_i32, %c0_i32_0 : i32, i32
  }
  func.func @transform_6(%arg0: i32) -> (i32, i32) {
    %c0_i32 = arith.constant 0 : i32
    %c0_i32_0 = arith.constant 0 : i32
    %c0_i32_1 = arith.constant 0 : i32
    return %c0_i32, %c0_i32_0 : i32, i32
  }
  func.func @transform_7(%arg0: i32) -> (i32, i32) {
    %c0_i32 = arith.constant 0 : i32
    %c0_i32_0 = arith.constant 0 : i32
    return %arg0, %c0_i32 : i32, i32
  }
  func.func @transform_8(%arg0: i32) -> (i32, i32) {
    %c0_i32 = arith.constant 0 : i32
    %c0_i32_0 = arith.constant 0 : i32
    return %arg0, %c0_i32 : i32, i32
  }
}

</mosaic_0001>

<bundles_post_ra>
// kernel: tpu_custom_call.1
= control target key start
LH: loop header
LB: loop body
LE: loop exit
PB: predicated region body
PF: predicated region fallthrough
CT: control target
= control target key end

     0   :  { %13 = vsyncpa [#allocation3], 0  ;;  %s1259_s0 = inlined_call_operand.hbm [shape: f32[2,32], index: 0, kind: input, shape index: {}]   ;;  %s1260_s1 = inlined_call_operand.hbm [shape: f32[32,512], index: 1, kind: input, shape index: {}]   ;;  %s1261_s2 = inlined_call_operand.hbm [shape: f32[1,512], index: 2, kind: input, shape index: {}]   ;;  %s1262_s3 = inlined_call_operand.hbm [shape: f32[512,256], index: 3, kind: input, shape index: {}]   ;;  %s1263_s4 = inlined_call_operand.hbm [shape: f32[1,256], index: 4, kind: input, shape index: {}]   ;;  %s1264_s5 = inlined_call_operand.hbm [shape: f32[256,512], index: 5, kind: input, shape index: {}]   ;;  %s1265_s6 = inlined_call_operand.vmem [shape: f32[1,512], index: 6, kind: input, shape index: {}]   ;;  %s1266_s7 = inlined_call_operand.hbm [shape: f32[2,512], index: 7, kind: input, shape index: {}]   ;;  %s1267_s8 = inlined_call_operand.hbm [shape: f32[2,512], index: 8, kind: output, shape index: {}]  }
   0x1   :  { %14 = vsyncpa [#allocation6], 0 }
   0x2   :  { %15 = vsyncpa [#allocation9], 0 }
   0x3   :  { %16 = vsyncpa [#allocation12], 0 }
   0x4   :  { %17 = vsyncpa [#allocation4], 0  ;;  %s35_s29 = sshll.u32 %s1260_s1, 4  ;;  %s36_s29 = int_to_ptr.hbm [resolvable:$true] %s35_s29 }
   0x5   :  { %21 = vsyncadd [#allocation3], 96  ;;  %s1156_s30 = smov [#allocation5]   ;;  %s59_s12 = sshll.u32 %s1262_s3, 4  ;;  %s60_s12 = int_to_ptr.hbm [resolvable:$true] %s59_s12 }
   0x6   :  { %s37_s9 = sshll.u32 %s1156_s30, 4  ;;  %s1157_s13 = smov 512   ;;  %s38_s9 = int_to_ptr.vmem [resolvable:$true] %s37_s9 }
   0x7   :  { %s1158_s14 = smov 32   ;;  %s1159_s15 = smov [#allocation8]  }
   0x8   :  { %43 = dma.hbm_to_vmem [thread:$0]  %s36_s29, 2048, %s38_s9, [#allocation6], %s1157_s13, %s1157_s13, %s1158_s14  }
   0x9   :  { %s61_s16 = sshll.u32 %s1159_s15, 4  ;;  %s1160_s1 = smov 256   ;;  %s62_s16 = int_to_ptr.vmem [resolvable:$true] %s61_s16 }
   0xa   :  { %s1161_s17 = smov 16   ;;  %s22_s20 = sshll.u32 %s1259_s0, 4  ;;  %s23_s20 = int_to_ptr.hbm [resolvable:$true] %s22_s20 }
   0xb   :  { %67 = dma.hbm_to_vmem [thread:$0]  %s60_s12, 16384, %s62_s16, [#allocation9], %s1160_s1, %s1160_s1, %s1161_s17  }
   0xc   :  { %s1162_s21 = smov [#allocation2]   ;;  %s1163_s22 = smov 2  }
   0xd   :  { %s24_s3 = sshll.u32 %s1162_s21, 4  ;;  %s49_s25 = sshll.u32 %s1261_s2, 4  ;;  %s25_s3 = int_to_ptr.vmem [resolvable:$true] %s24_s3  ;;  %s50_s25 = int_to_ptr.hbm [resolvable:$true] %s49_s25 }
   0xe   :  { %30 = dma.hbm_to_vmem [thread:$0]  %s23_s20, 32, %s25_s3, [#allocation3], %s1158_s14, %s1158_s14, %s1163_s22  }
   0xf   :  { %s1164_s26 = smov [#allocation7]   ;;  %s73_s0 = sshll.u32 %s1263_s4, 4  ;;  %s74_s0 = int_to_ptr.hbm [resolvable:$true] %s73_s0 }
  0x10   :  { %s51_s27 = sshll.u32 %s1164_s26, 4  ;;  %s1165_s30 = smov [#allocation10]   ;;  %s52_s27 = int_to_ptr.vmem [resolvable:$true] %s51_s27 }
  0x11   :  { %54 = dma.hbm_to_vmem [thread:$0]  %s50_s25, 64, %s52_s27, [#allocation6]  }
  0x12   :  { %s75_s9 = sshll.u32 %s1165_s30, 4  ;;  %s83_s12 = sshll.u32 %s1264_s5, 4  ;;  %s76_s9 = int_to_ptr.vmem [resolvable:$true] %s75_s9  ;;  %s84_s12 = int_to_ptr.hbm [resolvable:$true] %s83_s12 }
  0x13   :  { %78 = dma.hbm_to_vmem [thread:$0]  %s74_s0, 32, %s76_s9, [#allocation9]  }
  0x14   :  { %s1166_s2 = smov [#allocation11]  }
  0x15   :  { %s85_s15 = sshll.u32 %s1166_s2, 4  ;;  %s86_s15 = int_to_ptr.vmem [resolvable:$true] %s85_s15 }
  0x16   :  { %91 = dma.hbm_to_vmem [thread:$0]  %s84_s12, 16384, %s86_s15, [#allocation12], %s1157_s13, %s1157_s13, %s1158_s14  }
  0x17   :  { %97 = vsyncadd [#allocation12], 384  ;;  %s98_s1 = sshll.u32 %s1266_s7, 4  ;;  %s1167_s17 = smov [#allocation13]   ;;  %s99_s1 = int_to_ptr.hbm [resolvable:$true] %s98_s1 }
  0x18   :  { %s100_s18 = sshll.u32 %s1167_s17, 4  ;;  %s1168_s5 = smov 128   ;;  %s101_s18 = int_to_ptr.vmem [resolvable:$true] %s100_s18 }
  0x19   :  { %s1169_s19 = smov 8  }
  0x1a   :  { %106 = dma.hbm_to_vmem [thread:$0]  %s99_s1, 128, %s101_s18, [#allocation12], %s1168_s5, %s1168_s5, %s1169_s19  }
  0x1b   :  { %1146 = dma.done.wait [#allocation3], 128  }
  0x1c   :  { %1147 = vsyncadd [#allocation3], 4294967168 }
  0x1d   :  { %1148 = dma.done.wait [#allocation6], 2112  }
  0x1e   :  { %1149 = vsyncadd [#allocation6], 4294965184 }
  0x1f   :  { %1150 = dma.done.wait [#allocation9], 16416  }
  0x20   :  { %1151 = vsyncadd [#allocation9], 4294950880 }
  0x21   :  { %1152 = dma.done.wait [#allocation12], 16896  }
  0x22   :  { %1153 = vsyncadd [#allocation12], 4294950400  ;;  %v148_v0 = vld [vmem:[#allocation5 + $0x60] sm:$0xff]  ;;  %v149_v1 = vld [vmem:[#allocation5 + $0x68] sm:$0xff]  ;;  %vm162_vm0 = vcmask 261120   ;;  %vm884_vm1 = vcmask 1041408  }
  0x23   :  { %v150_v2 = vld [vmem:[#allocation5 + $0x70] sm:$0xff]  ;;  %178 = vmatpush.msra.mxu0 %v148_v0  ;;  %198 = vmatpush.msra.mxu1 %v149_v1  ;;  %v151_v3 = vld [vmem:[#allocation5 + $0x78] sm:$0xff]  ;;  %v144_v4 = vld [vmem:[#allocation5 + $0x40] sm:$0xff]  ;;  %vm886_vm2 = vcmask 1045508   ;;  %vm890_vm3 = vcmask 1043458   ;;  %vm892_vm4 = vcmask 1045504  }
  0x24   :  { %v145_v5 = vld [vmem:[#allocation5 + $0x48] sm:$0xff]  ;;  %218 = vmatpush.msra.mxu2 %v150_v2  ;;  %238 = vmatpush.msra.mxu3 %v151_v3  ;;  %v146_v6 = vld [vmem:[#allocation5 + $0x50] sm:$0xff]  ;;  %v147_v7 = vld [vmem:[#allocation5 + $0x58] sm:$0xff]  ;;  %vm888_vm5 = vcmask 1043456   ;;  %vm894_vm6 = vcmask 1045506  }
  0x25   :  { %v140_v8 = vld [vmem:[#allocation5 + $0x20] sm:$0xff]  ;;  %179 = vmatpush.msra.mxu0 %v144_v4  ;;  %199 = vmatpush.msra.mxu1 %v145_v5  ;;  %v141_v9 = vld [vmem:[#allocation5 + $0x28] sm:$0xff]  ;;  %v142_v10 = vld [vmem:[#allocation5 + $0x30] sm:$0xff] }
  0x26   :  { %v143_v11 = vld [vmem:[#allocation5 + $0x38] sm:$0xff]  ;;  %219 = vmatpush.msra.mxu2 %v146_v6  ;;  %239 = vmatpush.msra.mxu3 %v147_v7  ;;  %v136_v12 = vld [vmem:[#allocation5] sm:$0xff]  ;;  %v137_v13 = vld [vmem:[#allocation5 + $0x8] sm:$0xff] }
  0x27   :  { %180 = vmatpush.msra.mxu0 %v140_v8  ;;  %200 = vmatpush.msra.mxu1 %v141_v9  ;;  %v138_v14 = vld [vmem:[#allocation5 + $0x10] sm:$0xff]  ;;  %v139_v15 = vld [vmem:[#allocation5 + $0x18] sm:$0xff]  ;;  %v282_v21 = vld [vmem:[#allocation8 + $0xe0] sm:$0xff] }
  0x28   :  { %220 = vmatpush.msra.mxu2 %v142_v10  ;;  %240 = vmatpush.msra.mxu3 %v143_v11  ;;  %v135_v16 = vld [vmem:[#allocation2] sm:$0xff]  ;;  %v314_v22 = vld [vmem:[#allocation8 + $0x1e0] sm:$0xff] }
  0x29   :  { %181 = vmatpush.msra.mxu0 %v136_v12  ;;  %201 = vmatpush.msra.mxu1 %v137_v13  ;;  %v284_v17 = vld [vmem:[#allocation8 + $0xf0] sm:$0xff]  ;;  %v346_v23 = vld [vmem:[#allocation8 + $0x2e0] sm:$0xff] }
  0x2a   :  { %221 = vmatpush.msra.mxu2 %v138_v14  ;;  %241 = vmatpush.msra.mxu3 %v139_v15  ;;  %v316_v18 = vld [vmem:[#allocation8 + $0x1f0] sm:$0xff]  ;;  %v378_v24 = vld [vmem:[#allocation8 + $0x3e0] sm:$0xff]  ;;  %v285_v15 = vld [vmem:[#allocation8 + $0xf8] sm:$0xff] }
  0x2b   :  { %935 = vmatmul.msk.f32.vlgmr.msra.gmra.mxu0 %vm162_vm0, %v135_v16  ;;  %936 = vmatmul.msk.f32.vlgmr.msra.gmra.mxu1 %vm162_vm0, %v135_v16  ;;  %v348_v19 = vld [vmem:[#allocation8 + $0x2f0] sm:$0xff]  ;;  %v278_v29 = vld [vmem:[#allocation8 + $0xc0] sm:$0xff] }
  0x2c   :  { %v380_v20 = vld [vmem:[#allocation8 + $0x3f0] sm:$0xff]  ;;  %937 = vmatmul.msk.f32.vlgmr.msra.gmra.mxu2 %vm162_vm0, %v135_v16  ;;  %938 = vmatmul.msk.f32.vlgmr.msra.gmra.mxu3 %vm162_vm0, %v135_v16  ;;  %v310_v30 = vld [vmem:[#allocation8 + $0x1c0] sm:$0xff]  ;;  %v317_v16 = vld [vmem:[#allocation8 + $0x1f8] sm:$0xff] }
  0x2d   :  { %388 = vmatpush.msrb.mxu0 %v284_v17  ;;  %408 = vmatpush.msrb.mxu1 %v316_v18  ;;  %v280_v25 = vld [vmem:[#allocation8 + $0xd0] sm:$0xff]  ;;  %v342_v31 = vld [vmem:[#allocation8 + $0x2c0] sm:$0xff] }
  0x2e   :  { %v312_v26 = vld [vmem:[#allocation8 + $0x1d0] sm:$0xff]  ;;  %428 = vmatpush.msrb.mxu2 %v348_v19  ;;  %448 = vmatpush.msrb.mxu3 %v380_v20  ;;  %v374_v32 = vld [vmem:[#allocation8 + $0x3c0] sm:$0xff]  ;;  %v283_v19 = vld [vmem:[#allocation8 + $0xe8] sm:$0xff] }
  0x2f   :  { %389 = vmatpush.msrb.mxu0 %v282_v21  ;;  %409 = vmatpush.msrb.mxu1 %v314_v22  ;;  %v344_v27 = vld [vmem:[#allocation8 + $0x2d0] sm:$0xff]  ;;  %v274_v37 = vld [vmem:[#allocation8 + $0xa0] sm:$0xff]  ;;  %v315_v20 = vld [vmem:[#allocation8 + $0x1e8] sm:$0xff] }
  0x30   :  { %v376_v28 = vld [vmem:[#allocation8 + $0x3d0] sm:$0xff]  ;;  %429 = vmatpush.msrb.mxu2 %v346_v23  ;;  %449 = vmatpush.msrb.mxu3 %v378_v24  ;;  %v306_v38 = vld [vmem:[#allocation8 + $0x1a0] sm:$0xff]  ;;  %v349_v21 = vld [vmem:[#allocation8 + $0x2f8] sm:$0xff] }
  0x31   :  { %390 = vmatpush.msrb.mxu0 %v280_v25  ;;  %410 = vmatpush.msrb.mxu1 %v312_v26  ;;  %v276_v33 = vld [vmem:[#allocation8 + $0xb0] sm:$0xff]  ;;  %v338_v39 = vld [vmem:[#allocation8 + $0x2a0] sm:$0xff]  ;;  %v381_v22 = vld [vmem:[#allocation8 + $0x3f8] sm:$0xff] }
  0x32   :  { %v308_v34 = vld [vmem:[#allocation8 + $0x1b0] sm:$0xff]  ;;  %430 = vmatpush.msrb.mxu2 %v344_v27  ;;  %450 = vmatpush.msrb.mxu3 %v376_v28  ;;  %v370_v40 = vld [vmem:[#allocation8 + $0x3a0] sm:$0xff]  ;;  %v281_v23 = vld [vmem:[#allocation8 + $0xd8] sm:$0xff] }
  0x33   :  { %391 = vmatpush.msrb.mxu0 %v278_v29  ;;  %411 = vmatpush.msrb.mxu1 %v310_v30  ;;  %v340_v35 = vld [vmem:[#allocation8 + $0x2b0] sm:$0xff]  ;;  %v270_v45 = vld [vmem:[#allocation8 + $0x80] sm:$0xff]  ;;  %v313_v24 = vld [vmem:[#allocation8 + $0x1d8] sm:$0xff] }
  0x34   :  { %v372_v36 = vld [vmem:[#allocation8 + $0x3b0] sm:$0xff]  ;;  %431 = vmatpush.msrb.mxu2 %v342_v31  ;;  %451 = vmatpush.msrb.mxu3 %v374_v32  ;;  %v302_v46 = vld [vmem:[#allocation8 + $0x180] sm:$0xff]  ;;  %v347_v25 = vld [vmem:[#allocation8 + $0x2e8] sm:$0xff] }
  0x35   :  { %392 = vmatpush.msrb.mxu0 %v276_v33  ;;  %412 = vmatpush.msrb.mxu1 %v308_v34  ;;  %v272_v41 = vld [vmem:[#allocation8 + $0x90] sm:$0xff]  ;;  %v334_v47 = vld [vmem:[#allocation8 + $0x280] sm:$0xff]  ;;  %v379_v26 = vld [vmem:[#allocation8 + $0x3e8] sm:$0xff] }
  0x36   :  { %v304_v42 = vld [vmem:[#allocation8 + $0x190] sm:$0xff]  ;;  %432 = vmatpush.msrb.mxu2 %v340_v35  ;;  %452 = vmatpush.msrb.mxu3 %v372_v36  ;;  %v366_v48 = vld [vmem:[#allocation8 + $0x380] sm:$0xff]  ;;  %v279_v27 = vld [vmem:[#allocation8 + $0xc8] sm:$0xff] }
  0x37   :  { %393 = vmatpush.msrb.mxu0 %v274_v37  ;;  %413 = vmatpush.msrb.mxu1 %v306_v38  ;;  %v336_v43 = vld [vmem:[#allocation8 + $0x290] sm:$0xff]  ;;  %v266_v53 = vld [vmem:[#allocation8 + $0x60] sm:$0xff]  ;;  %v311_v28 = vld [vmem:[#allocation8 + $0x1c8] sm:$0xff] }
  0x38   :  { %v368_v44 = vld [vmem:[#allocation8 + $0x390] sm:$0xff]  ;;  %433 = vmatpush.msrb.mxu2 %v338_v39  ;;  %453 = vmatpush.msrb.mxu3 %v370_v40  ;;  %v298_v54 = vld [vmem:[#allocation8 + $0x160] sm:$0xff]  ;;  %v345_v29 = vld [vmem:[#allocation8 + $0x2d8] sm:$0xff] }
  0x39   :  { %394 = vmatpush.msrb.mxu0 %v272_v41  ;;  %414 = vmatpush.msrb.mxu1 %v304_v42  ;;  %v268_v49 = vld [vmem:[#allocation8 + $0x70] sm:$0xff]  ;;  %v330_v55 = vld [vmem:[#allocation8 + $0x260] sm:$0xff]  ;;  %v377_v30 = vld [vmem:[#allocation8 + $0x3d8] sm:$0xff] }
  0x3a   :  { %v300_v50 = vld [vmem:[#allocation8 + $0x170] sm:$0xff]  ;;  %434 = vmatpush.msrb.mxu2 %v336_v43  ;;  %454 = vmatpush.msrb.mxu3 %v368_v44  ;;  %v362_v56 = vld [vmem:[#allocation8 + $0x360] sm:$0xff]  ;;  %v277_v31 = vld [vmem:[#allocation8 + $0xb8] sm:$0xff] }
  0x3b   :  { %395 = vmatpush.msrb.mxu0 %v270_v45  ;;  %415 = vmatpush.msrb.mxu1 %v302_v46  ;;  %v332_v51 = vld [vmem:[#allocation8 + $0x270] sm:$0xff]  ;;  %v262_v61 = vld [vmem:[#allocation8 + $0x40] sm:$0xff]  ;;  %v309_v32 = vld [vmem:[#allocation8 + $0x1b8] sm:$0xff] }
  0x3c   :  { %v364_v52 = vld [vmem:[#allocation8 + $0x370] sm:$0xff]  ;;  %435 = vmatpush.msrb.mxu2 %v334_v47  ;;  %455 = vmatpush.msrb.mxu3 %v366_v48  ;;  %v294_v62 = vld [vmem:[#allocation8 + $0x140] sm:$0xff]  ;;  %v343_v33 = vld [vmem:[#allocation8 + $0x2c8] sm:$0xff] }
  0x3d   :  { %396 = vmatpush.msrb.mxu0 %v268_v49  ;;  %416 = vmatpush.msrb.mxu1 %v300_v50  ;;  %v264_v57 = vld [vmem:[#allocation8 + $0x50] sm:$0xff]  ;;  %v326_v63 = vld [vmem:[#allocation8 + $0x240] sm:$0xff]  ;;  %v375_v34 = vld [vmem:[#allocation8 + $0x3c8] sm:$0xff] }
  0x3e   :  { %v296_v58 = vld [vmem:[#allocation8 + $0x150] sm:$0xff]  ;;  %436 = vmatpush.msrb.mxu2 %v332_v51  ;;  %456 = vmatpush.msrb.mxu3 %v364_v52  ;;  %v358_v0 = vld [vmem:[#allocation8 + $0x340] sm:$0xff]  ;;  %v275_v35 = vld [vmem:[#allocation8 + $0xa8] sm:$0xff] }
  0x3f   :  { %397 = vmatpush.msrb.mxu0 %v266_v53  ;;  %417 = vmatpush.msrb.mxu1 %v298_v54  ;;  %v328_v59 = vld [vmem:[#allocation8 + $0x250] sm:$0xff]  ;;  %v258_v5 = vld [vmem:[#allocation8 + $0x20] sm:$0xff]  ;;  %v307_v36 = vld [vmem:[#allocation8 + $0x1a8] sm:$0xff] }
  0x40   :  { %v360_v60 = vld [vmem:[#allocation8 + $0x350] sm:$0xff]  ;;  %437 = vmatpush.msrb.mxu2 %v330_v55  ;;  %457 = vmatpush.msrb.mxu3 %v362_v56  ;;  %v290_v6 = vld [vmem:[#allocation8 + $0x120] sm:$0xff]  ;;  %v341_v37 = vld [vmem:[#allocation8 + $0x2b8] sm:$0xff] }
  0x41   :  { %398 = vmatpush.msrb.mxu0 %v264_v57  ;;  %418 = vmatpush.msrb.mxu1 %v296_v58  ;;  %v260_v1 = vld [vmem:[#allocation8 + $0x30] sm:$0xff]  ;;  %v322_v7 = vld [vmem:[#allocation8 + $0x220] sm:$0xff]  ;;  %v373_v38 = vld [vmem:[#allocation8 + $0x3b8] sm:$0xff] }
  0x42   :  { %v292_v2 = vld [vmem:[#allocation8 + $0x130] sm:$0xff]  ;;  %438 = vmatpush.msrb.mxu2 %v328_v59  ;;  %458 = vmatpush.msrb.mxu3 %v360_v60  ;;  %v354_v8 = vld [vmem:[#allocation8 + $0x320] sm:$0xff]  ;;  %v273_v39 = vld [vmem:[#allocation8 + $0x98] sm:$0xff] }
  0x43   :  { %399 = vmatpush.msrb.mxu0 %v262_v61  ;;  %419 = vmatpush.msrb.mxu1 %v294_v62  ;;  %v324_v3 = vld [vmem:[#allocation8 + $0x230] sm:$0xff]  ;;  %v254_v13 = vld [vmem:[#allocation8] sm:$0xff]  ;;  %v305_v40 = vld [vmem:[#allocation8 + $0x198] sm:$0xff] }
  0x44   :  { %v356_v4 = vld [vmem:[#allocation8 + $0x330] sm:$0xff]  ;;  %439 = vmatpush.msrb.mxu2 %v326_v63  ;;  %459 = vmatpush.msrb.mxu3 %v358_v0  ;;  %v286_v14 = vld [vmem:[#allocation8 + $0x100] sm:$0xff]  ;;  %v271_v41 = vld [vmem:[#allocation8 + $0x88] sm:$0xff] }
  0x45   :  { %400 = vmatpush.msrb.mxu0 %v260_v1  ;;  %420 = vmatpush.msrb.mxu1 %v292_v2  ;;  %v256_v9 = vld [vmem:[#allocation8 + $0x10] sm:$0xff]  ;;  %v318_v17 = vld [vmem:[#allocation8 + $0x200] sm:$0xff]  ;;  %v303_v42 = vld [vmem:[#allocation8 + $0x188] sm:$0xff] }
  0x46   :  { %v288_v10 = vld [vmem:[#allocation8 + $0x110] sm:$0xff]  ;;  %440 = vmatpush.msrb.mxu2 %v324_v3  ;;  %460 = vmatpush.msrb.mxu3 %v356_v4  ;;  %v350_v18 = vld [vmem:[#allocation8 + $0x300] sm:$0xff]  ;;  %v269_v43 = vld [vmem:[#allocation8 + $0x78] sm:$0xff] }
  0x47   :  { %401 = vmatpush.msrb.mxu0 %v258_v5  ;;  %421 = vmatpush.msrb.mxu1 %v290_v6  ;;  %v320_v11 = vld [vmem:[#allocation8 + $0x210] sm:$0xff]  ;;  %v301_v44 = vld [vmem:[#allocation8 + $0x178] sm:$0xff]  ;;  %v339_v45 = vld [vmem:[#allocation8 + $0x2a8] sm:$0xff] }
  0x48   :  { %v352_v12 = vld [vmem:[#allocation8 + $0x310] sm:$0xff]  ;;  %441 = vmatpush.msrb.mxu2 %v322_v7  ;;  %461 = vmatpush.msrb.mxu3 %v354_v8  ;;  %v371_v46 = vld [vmem:[#allocation8 + $0x3a8] sm:$0xff]  ;;  %v337_v49 = vld [vmem:[#allocation8 + $0x298] sm:$0xff] }
  0x49   :  { %402 = vmatpush.msrb.mxu0 %v256_v9  ;;  %422 = vmatpush.msrb.mxu1 %v288_v10  ;;  %v267_v47 = vld [vmem:[#allocation8 + $0x68] sm:$0xff]  ;;  %v369_v50 = vld [vmem:[#allocation8 + $0x398] sm:$0xff] }
  0x4a   :  { %442 = vmatpush.msrb.mxu2 %v320_v11  ;;  %462 = vmatpush.msrb.mxu3 %v352_v12  ;;  %v299_v48 = vld [vmem:[#allocation8 + $0x168] sm:$0xff]  ;;  %v265_v51 = vld [vmem:[#allocation8 + $0x58] sm:$0xff] }
  0x4b   :  { %403 = vmatpush.msrb.mxu0 %v254_v13  ;;  %423 = vmatpush.msrb.mxu1 %v286_v14  ;;  %v297_v52 = vld [vmem:[#allocation8 + $0x158] sm:$0xff]  ;;  %v335_v53 = vld [vmem:[#allocation8 + $0x288] sm:$0xff] }
  0x4c   :  { %443 = vmatpush.msrb.mxu2 %v318_v17  ;;  %463 = vmatpush.msrb.mxu3 %v350_v18  ;;  %v367_v54 = vld [vmem:[#allocation8 + $0x388] sm:$0xff]  ;;  %v333_v57 = vld [vmem:[#allocation8 + $0x278] sm:$0xff] }
  0x4d   :  { %468 = vmatpush.msra.mxu0 %v285_v15  ;;  %488 = vmatpush.msra.mxu1 %v317_v16  ;;  %v263_v55 = vld [vmem:[#allocation8 + $0x48] sm:$0xff]  ;;  %v365_v58 = vld [vmem:[#allocation8 + $0x378] sm:$0xff] }
  0x4e   :  { %508 = vmatpush.msra.mxu2 %v349_v21  ;;  %528 = vmatpush.msra.mxu3 %v381_v22  ;;  %v295_v56 = vld [vmem:[#allocation8 + $0x148] sm:$0xff]  ;;  %v261_v59 = vld [vmem:[#allocation8 + $0x38] sm:$0xff] }
  0x4f   :  { %469 = vmatpush.msra.mxu0 %v283_v19  ;;  %489 = vmatpush.msra.mxu1 %v315_v20  ;;  %v293_v60 = vld [vmem:[#allocation8 + $0x138] sm:$0xff]  ;;  %v331_v61 = vld [vmem:[#allocation8 + $0x268] sm:$0xff] }
  0x50   :  { %509 = vmatpush.msra.mxu2 %v347_v25  ;;  %529 = vmatpush.msra.mxu3 %v379_v26  ;;  %v363_v62 = vld [vmem:[#allocation8 + $0x368] sm:$0xff]  ;;  %v329_v1 = vld [vmem:[#allocation8 + $0x258] sm:$0xff] }
  0x51   :  { %470 = vmatpush.msra.mxu0 %v281_v23  ;;  %490 = vmatpush.msra.mxu1 %v313_v24  ;;  %v259_v63 = vld [vmem:[#allocation8 + $0x28] sm:$0xff]  ;;  %v361_v2 = vld [vmem:[#allocation8 + $0x358] sm:$0xff] }
  0x52   :  { %510 = vmatpush.msra.mxu2 %v345_v29  ;;  %530 = vmatpush.msra.mxu3 %v377_v30  ;;  %v291_v0 = vld [vmem:[#allocation8 + $0x128] sm:$0xff]  ;;  %v257_v3 = vld [vmem:[#allocation8 + $0x18] sm:$0xff] }
  0x53   :  { %471 = vmatpush.msra.mxu0 %v279_v27  ;;  %491 = vmatpush.msra.mxu1 %v311_v28  ;;  %v289_v4 = vld [vmem:[#allocation8 + $0x118] sm:$0xff]  ;;  %v327_v5 = vld [vmem:[#allocation8 + $0x248] sm:$0xff] }
  0x54   :  { %511 = vmatpush.msra.mxu2 %v343_v33  ;;  %531 = vmatpush.msra.mxu3 %v375_v34  ;;  %v359_v6 = vld [vmem:[#allocation8 + $0x348] sm:$0xff]  ;;  %v325_v9 = vld [vmem:[#allocation8 + $0x238] sm:$0xff] }
  0x55   :  { %472 = vmatpush.msra.mxu0 %v277_v31  ;;  %492 = vmatpush.msra.mxu1 %v309_v32  ;;  %v255_v7 = vld [vmem:[#allocation8 + $0x8] sm:$0xff]  ;;  %v357_v10 = vld [vmem:[#allocation8 + $0x338] sm:$0xff] }
  0x56   :  { %512 = vmatpush.msra.mxu2 %v341_v37  ;;  %532 = vmatpush.msra.mxu3 %v373_v38  ;;  %v287_v8 = vld [vmem:[#allocation8 + $0x108] sm:$0xff]  ;;  %v321_v13 = vld [vmem:[#allocation8 + $0x218] sm:$0xff] }
  0x57   :  { %473 = vmatpush.msra.mxu0 %v275_v35  ;;  %493 = vmatpush.msra.mxu1 %v307_v36  ;;  %v323_v11 = vld [vmem:[#allocation8 + $0x228] sm:$0xff]  ;;  %v353_v14 = vld [vmem:[#allocation8 + $0x318] sm:$0xff] }
  0x58   :  { %513 = vmatpush.msra.mxu2 %v339_v45  ;;  %533 = vmatpush.msra.mxu3 %v371_v46  ;;  %v355_v12 = vld [vmem:[#allocation8 + $0x328] sm:$0xff]  ;;  %v152_v17 = vld [vmem:[#allocation7] sm:$0xf] }
  0x59   :  { %474 = vmatpush.msra.mxu0 %v273_v39  ;;  %494 = vmatpush.msra.mxu1 %v305_v40  ;;  %v319_v15 = vld [vmem:[#allocation8 + $0x208] sm:$0xff]  ;;  %v154_v18 = vperm.slane %v152_v17, 0  ;;  %v155_v19 = vperm.slane %v152_v17, 1  ;;  %v156_v26 = vperm.slane %v152_v17, 2  ;;  %v157_v27 = vperm.slane %v152_v17, 3 }
  0x5a   :  { %514 = vmatpush.msra.mxu2 %v337_v49  ;;  %534 = vmatpush.msra.mxu3 %v369_v50  ;;  %v351_v16 = vld [vmem:[#allocation8 + $0x308] sm:$0xff] }
  0x5b   :  { %475 = vmatpush.msra.mxu0 %v271_v41  ;;  %495 = vmatpush.msra.mxu1 %v303_v42  ;;  %v612_v30 = vld [vmem:[#allocation11 + $0x1e0] sm:$0xff]  ;;  %v677_v46 = vld [vmem:[#allocation11 + $0x3e8] sm:$0xff] }
  0x5c   :  { %515 = vmatpush.msra.mxu2 %v335_v53  ;;  %535 = vmatpush.msra.mxu3 %v367_v54  ;;  %v676_v31 = vld [vmem:[#allocation11 + $0x3e0] sm:$0xff]  ;;  %v673_v50 = vld [vmem:[#allocation11 + $0x3c8] sm:$0xff] }
  0x5d   :  { %476 = vmatpush.msra.mxu0 %v269_v43  ;;  %496 = vmatpush.msra.mxu1 %v301_v44  ;;  %v608_v34 = vld [vmem:[#allocation11 + $0x1c0] sm:$0xff]  ;;  %v613_v44 = vld [vmem:[#allocation11 + $0x1e8] sm:$0xff] }
  0x5e   :  { %516 = vmatpush.msra.mxu2 %v333_v57  ;;  %536 = vmatpush.msra.mxu3 %v365_v58  ;;  %v672_v35 = vld [vmem:[#allocation11 + $0x3c0] sm:$0xff]  ;;  %v669_v54 = vld [vmem:[#allocation11 + $0x3a8] sm:$0xff] }
  0x5f   :  { %477 = vmatpush.msra.mxu0 %v267_v47  ;;  %497 = vmatpush.msra.mxu1 %v299_v48  ;;  %v604_v38 = vld [vmem:[#allocation11 + $0x1a0] sm:$0xff]  ;;  %v609_v48 = vld [vmem:[#allocation11 + $0x1c8] sm:$0xff] }
  0x60   :  { %517 = vmatpush.msra.mxu2 %v331_v61  ;;  %537 = vmatpush.msra.mxu3 %v363_v62  ;;  %v668_v39 = vld [vmem:[#allocation11 + $0x3a0] sm:$0xff]  ;;  %v665_v58 = vld [vmem:[#allocation11 + $0x388] sm:$0xff] }
  0x61   :  { %478 = vmatpush.msra.mxu0 %v265_v51  ;;  %498 = vmatpush.msra.mxu1 %v297_v52  ;;  %v600_v45 = vld [vmem:[#allocation11 + $0x180] sm:$0xff]  ;;  %v605_v52 = vld [vmem:[#allocation11 + $0x1a8] sm:$0xff] }
  0x62   :  { %518 = vmatpush.msra.mxu2 %v329_v1  ;;  %538 = vmatpush.msra.mxu3 %v361_v2  ;;  %v664_v47 = vld [vmem:[#allocation11 + $0x380] sm:$0xff]  ;;  %v661_v62 = vld [vmem:[#allocation11 + $0x368] sm:$0xff] }
  0x63   :  { %479 = vmatpush.msra.mxu0 %v263_v55  ;;  %499 = vmatpush.msra.mxu1 %v295_v56  ;;  %v596_v49 = vld [vmem:[#allocation11 + $0x160] sm:$0xff]  ;;  %v601_v56 = vld [vmem:[#allocation11 + $0x188] sm:$0xff] }
  0x64   :  { %519 = vmatpush.msra.mxu2 %v327_v5  ;;  %539 = vmatpush.msra.mxu3 %v359_v6  ;;  %v660_v51 = vld [vmem:[#allocation11 + $0x360] sm:$0xff]  ;;  %v657_v2 = vld [vmem:[#allocation11 + $0x348] sm:$0xff] }
  0x65   :  { %480 = vmatpush.msra.mxu0 %v261_v59  ;;  %500 = vmatpush.msra.mxu1 %v293_v60  ;;  %v592_v53 = vld [vmem:[#allocation11 + $0x140] sm:$0xff]  ;;  %v597_v60 = vld [vmem:[#allocation11 + $0x168] sm:$0xff] }
  0x66   :  { %520 = vmatpush.msra.mxu2 %v325_v9  ;;  %540 = vmatpush.msra.mxu3 %v357_v10  ;;  %v656_v55 = vld [vmem:[#allocation11 + $0x340] sm:$0xff]  ;;  %v653_v6 = vld [vmem:[#allocation11 + $0x328] sm:$0xff] }
  0x67   :  { %481 = vmatpush.msra.mxu0 %v259_v63  ;;  %501 = vmatpush.msra.mxu1 %v291_v0  ;;  %v588_v57 = vld [vmem:[#allocation11 + $0x120] sm:$0xff]  ;;  %v593_v0 = vld [vmem:[#allocation11 + $0x148] sm:$0xff] }
  0x68   :  { %521 = vmatpush.msra.mxu2 %v323_v11  ;;  %541 = vmatpush.msra.mxu3 %v355_v12  ;;  %v652_v59 = vld [vmem:[#allocation11 + $0x320] sm:$0xff]  ;;  %v649_v10 = vld [vmem:[#allocation11 + $0x308] sm:$0xff] }
  0x69   :  { %482 = vmatpush.msra.mxu0 %v257_v3  ;;  %502 = vmatpush.msra.mxu1 %v289_v4  ;;  %v584_v61 = vld [vmem:[#allocation11 + $0x100] sm:$0xff]  ;;  %v589_v4 = vld [vmem:[#allocation11 + $0x128] sm:$0xff] }
  0x6a   :  { %522 = vmatpush.msra.mxu2 %v321_v13  ;;  %542 = vmatpush.msra.mxu3 %v353_v14  ;;  %v648_v63 = vld [vmem:[#allocation11 + $0x300] sm:$0xff]  ;;  %v581_v12 = vld [vmem:[#allocation11 + $0xe8] sm:$0xff] }
  0x6b   :  { %483 = vmatpush.msra.mxu0 %v255_v7  ;;  %503 = vmatpush.msra.mxu1 %v287_v8  ;;  %v580_v1 = vld [vmem:[#allocation11 + $0xe0] sm:$0xff]  ;;  %v585_v8 = vld [vmem:[#allocation11 + $0x108] sm:$0xff] }
  0x6c   :  { %523 = vmatpush.msra.mxu2 %v319_v15  ;;  %543 = vmatpush.msra.mxu3 %v351_v16  ;;  %v644_v3 = vld [vmem:[#allocation11 + $0x2e0] sm:$0xff]  ;;  %v645_v14 = vld [vmem:[#allocation11 + $0x2e8] sm:$0xff] }
  0x6d   :  { %v576_v5 = vld [vmem:[#allocation11 + $0xc0] sm:$0xff]  ;;  %v577_v16 = vld [vmem:[#allocation11 + $0xc8] sm:$0xff] }
  0x6e   :  { %v640_v7 = vld [vmem:[#allocation11 + $0x2c0] sm:$0xff] }
  0x6f   :  { %v572_v9 = vld [vmem:[#allocation11 + $0xa0] sm:$0xff] }
  0x70   :  { %v636_v11 = vld [vmem:[#allocation11 + $0x2a0] sm:$0xff] }
  0x71   :  { %v568_v13 = vld [vmem:[#allocation11 + $0x80] sm:$0xff] }
  0x72   :  { %v632_v15 = vld [vmem:[#allocation11 + $0x280] sm:$0xff] }
  0x73   :  { %v564_v17 = vld [vmem:[#allocation11 + $0x60] sm:$0xff] }
  0xa8   :  { %v183_v20 = vpop.f32.mrf.mxu0  ;;  %v203_v21 = vpop.f32.mrf.mxu1 }
  0xa9   :  { %v184_v22 = vadd.f32 %v183_v20, %v154_v18  ;;  %v204_v23 = vadd.f32 %v203_v21, %v155_v19  ;;  %v641_v18 = vld [vmem:[#allocation11 + $0x2c8] sm:$0xff]  ;;  %v628_v19 = vld [vmem:[#allocation11 + $0x260] sm:$0xff] }
  0xaa   :  { %v573_v20 = vld [vmem:[#allocation11 + $0xa8] sm:$0xff]  ;;  %v560_v21 = vld [vmem:[#allocation11 + $0x40] sm:$0xff] }
  0xab   :  { %v246_v24 = vmul.f32 0.2, %v184_v22  ;;  %v247_v25 = vmul.f32 0.2, %v204_v23 }
  0xad   :  { %v250_v28 = vmax.f32 %v184_v22, %v246_v24  ;;  %v251_v29 = vmax.f32 %v204_v23, %v247_v25  ;;  %v637_v22 = vld [vmem:[#allocation11 + $0x2a8] sm:$0xff]  ;;  %v556_v24 = vld [vmem:[#allocation11 + $0x20] sm:$0xff] }
  0xae   :  { %v569_v23 = vld [vmem:[#allocation11 + $0x88] sm:$0xff] }
  0xaf   :  { %v223_v32 = vpop.f32.mrf.mxu2  ;;  %v243_v33 = vpop.f32.mrf.mxu3  ;;  %404 = vmatmul.f32.vlgmr.msrb.gmra.mxu0 %v250_v28  ;;  %424 = vmatmul.f32.vlgmr.msrb.gmra.mxu1 %v251_v29  ;;  %v633_v25 = vld [vmem:[#allocation11 + $0x288] sm:$0xff] }
  0xb0   :  { %v224_v36 = vadd.f32 %v223_v32, %v156_v26  ;;  %v244_v37 = vadd.f32 %v243_v33, %v157_v27  ;;  %690 = vmatpush.msrb.mxu0 %v612_v30  ;;  %710 = vmatpush.msrb.mxu1 %v676_v31  ;;  %v565_v26 = vld [vmem:[#allocation11 + $0x68] sm:$0xff]  ;;  %v552_v27 = vld [vmem:[#allocation11] sm:$0xff]  ;;  %v615_v33 = vld [vmem:[#allocation11 + $0x1f8] sm:$0xff] }
  0xb1   :  { %v561_v30 = vld [vmem:[#allocation11 + $0x48] sm:$0xff] }
  0xb2   :  { %v248_v40 = vmul.f32 0.2, %v224_v36  ;;  %v249_v41 = vmul.f32 0.2, %v244_v37  ;;  %691 = vmatpush.msrb.mxu0 %v608_v34  ;;  %711 = vmatpush.msrb.mxu1 %v672_v35  ;;  %v557_v31 = vld [vmem:[#allocation11 + $0x28] sm:$0xff]  ;;  %v610_v34 = vld [vmem:[#allocation11 + $0x1d0] sm:$0xff] }
  0xb3   :  { %v553_v32 = vld [vmem:[#allocation11 + $0x8] sm:$0xff]  ;;  %v611_v35 = vld [vmem:[#allocation11 + $0x1d8] sm:$0xff] }
  0xb4   :  { %v252_v42 = vmax.f32 %v224_v36, %v248_v40  ;;  %v253_v43 = vmax.f32 %v244_v37, %v249_v41  ;;  %692 = vmatpush.msrb.mxu0 %v604_v38  ;;  %712 = vmatpush.msrb.mxu1 %v668_v39  ;;  %v624_v36 = vld [vmem:[#allocation11 + $0x240] sm:$0xff]  ;;  %v625_v37 = vld [vmem:[#allocation11 + $0x248] sm:$0xff]  ;;  %v606_v38 = vld [vmem:[#allocation11 + $0x1b0] sm:$0xff] }
  0xb5   :  { %v607_v39 = vld [vmem:[#allocation11 + $0x1b8] sm:$0xff]  ;;  %v620_v40 = vld [vmem:[#allocation11 + $0x220] sm:$0xff]  ;;  %v621_v41 = vld [vmem:[#allocation11 + $0x228] sm:$0xff] }
  0xb6   :  { %444 = vmatmul.f32.vlgmr.msrb.gmra.mxu2 %v252_v42  ;;  %464 = vmatmul.f32.vlgmr.msrb.gmra.mxu3 %v253_v43 }
  0xb7   :  { %484 = vmatmul.f32.vlgmr.msra.gmra.mxu0 %v250_v28  ;;  %504 = vmatmul.f32.vlgmr.msra.gmra.mxu1 %v251_v29  ;;  %v614_v28 = vld [vmem:[#allocation11 + $0x1f0] sm:$0xff]  ;;  %v629_v29 = vld [vmem:[#allocation11 + $0x268] sm:$0xff] }
  0xb8   :  { %730 = vmatpush.msrb.mxu2 %v613_v44  ;;  %693 = vmatpush.msrb.mxu0 %v600_v45  ;;  %v616_v44 = vld [vmem:[#allocation11 + $0x200] sm:$0xff]  ;;  %v617_v45 = vld [vmem:[#allocation11 + $0x208] sm:$0xff] }
  0xb9   :  { %750 = vmatpush.msrb.mxu3 %v677_v46  ;;  %713 = vmatpush.msrb.mxu1 %v664_v47  ;;  %v598_v46 = vld [vmem:[#allocation11 + $0x170] sm:$0xff] }
  0xba   :  { %731 = vmatpush.msrb.mxu2 %v609_v48  ;;  %694 = vmatpush.msrb.mxu0 %v596_v49  ;;  %v678_v47 = vld [vmem:[#allocation11 + $0x3f0] sm:$0xff]  ;;  %v599_v48 = vld [vmem:[#allocation11 + $0x178] sm:$0xff] }
  0xbb   :  { %751 = vmatpush.msrb.mxu3 %v673_v50  ;;  %714 = vmatpush.msrb.mxu1 %v660_v51  ;;  %v679_v49 = vld [vmem:[#allocation11 + $0x3f8] sm:$0xff]  ;;  %v594_v50 = vld [vmem:[#allocation11 + $0x150] sm:$0xff] }
  0xbc   :  { %732 = vmatpush.msrb.mxu2 %v605_v52  ;;  %695 = vmatpush.msrb.mxu0 %v592_v53  ;;  %v674_v51 = vld [vmem:[#allocation11 + $0x3d0] sm:$0xff]  ;;  %v595_v52 = vld [vmem:[#allocation11 + $0x158] sm:$0xff] }
  0xbd   :  { %752 = vmatpush.msrb.mxu3 %v669_v54  ;;  %715 = vmatpush.msrb.mxu1 %v656_v55  ;;  %v675_v53 = vld [vmem:[#allocation11 + $0x3d8] sm:$0xff]  ;;  %v590_v54 = vld [vmem:[#allocation11 + $0x130] sm:$0xff] }
  0xbe   :  { %524 = vmatmul.f32.vlgmr.msra.gmra.mxu2 %v252_v42  ;;  %544 = vmatmul.f32.vlgmr.msra.gmra.mxu3 %v253_v43  ;;  %v602_v42 = vld [vmem:[#allocation11 + $0x190] sm:$0xff]  ;;  %v603_v43 = vld [vmem:[#allocation11 + $0x198] sm:$0xff] }
  0xbf   :  { %733 = vmatpush.msrb.mxu2 %v601_v56  ;;  %696 = vmatpush.msrb.mxu0 %v588_v57  ;;  %v670_v55 = vld [vmem:[#allocation11 + $0x3b0] sm:$0xff]  ;;  %v591_v56 = vld [vmem:[#allocation11 + $0x138] sm:$0xff] }
  0xc0   :  { %753 = vmatpush.msrb.mxu3 %v665_v58  ;;  %716 = vmatpush.msrb.mxu1 %v652_v59  ;;  %v671_v57 = vld [vmem:[#allocation11 + $0x3b8] sm:$0xff]  ;;  %v586_v58 = vld [vmem:[#allocation11 + $0x110] sm:$0xff] }
  0xc1   :  { %734 = vmatpush.msrb.mxu2 %v597_v60  ;;  %697 = vmatpush.msrb.mxu0 %v584_v61  ;;  %v666_v59 = vld [vmem:[#allocation11 + $0x390] sm:$0xff]  ;;  %v587_v60 = vld [vmem:[#allocation11 + $0x118] sm:$0xff] }
  0xc2   :  { %754 = vmatpush.msrb.mxu3 %v661_v62  ;;  %717 = vmatpush.msrb.mxu1 %v648_v63  ;;  %v667_v61 = vld [vmem:[#allocation11 + $0x398] sm:$0xff]  ;;  %v582_v62 = vld [vmem:[#allocation11 + $0xf0] sm:$0xff] }
  0xc3   :  { %735 = vmatpush.msrb.mxu2 %v593_v0  ;;  %698 = vmatpush.msrb.mxu0 %v580_v1  ;;  %v662_v63 = vld [vmem:[#allocation11 + $0x370] sm:$0xff]  ;;  %v583_v0 = vld [vmem:[#allocation11 + $0xf8] sm:$0xff] }
  0xc4   :  { %755 = vmatpush.msrb.mxu3 %v657_v2  ;;  %718 = vmatpush.msrb.mxu1 %v644_v3  ;;  %v663_v1 = vld [vmem:[#allocation11 + $0x378] sm:$0xff]  ;;  %v578_v2 = vld [vmem:[#allocation11 + $0xd0] sm:$0xff] }
  0xc5   :  { %736 = vmatpush.msrb.mxu2 %v589_v4  ;;  %699 = vmatpush.msrb.mxu0 %v576_v5  ;;  %v658_v3 = vld [vmem:[#allocation11 + $0x350] sm:$0xff]  ;;  %v579_v4 = vld [vmem:[#allocation11 + $0xd8] sm:$0xff] }
  0xc6   :  { %756 = vmatpush.msrb.mxu3 %v653_v6  ;;  %719 = vmatpush.msrb.mxu1 %v640_v7  ;;  %v659_v5 = vld [vmem:[#allocation11 + $0x358] sm:$0xff]  ;;  %v574_v6 = vld [vmem:[#allocation11 + $0xb0] sm:$0xff] }
  0xc7   :  { %737 = vmatpush.msrb.mxu2 %v585_v8  ;;  %700 = vmatpush.msrb.mxu0 %v572_v9  ;;  %v654_v7 = vld [vmem:[#allocation11 + $0x330] sm:$0xff]  ;;  %v575_v8 = vld [vmem:[#allocation11 + $0xb8] sm:$0xff] }
  0xc8   :  { %757 = vmatpush.msrb.mxu3 %v649_v10  ;;  %720 = vmatpush.msrb.mxu1 %v636_v11  ;;  %v655_v9 = vld [vmem:[#allocation11 + $0x338] sm:$0xff]  ;;  %v570_v10 = vld [vmem:[#allocation11 + $0x90] sm:$0xff] }
  0xc9   :  { %738 = vmatpush.msrb.mxu2 %v581_v12  ;;  %701 = vmatpush.msrb.mxu0 %v568_v13  ;;  %v650_v11 = vld [vmem:[#allocation11 + $0x310] sm:$0xff]  ;;  %v571_v12 = vld [vmem:[#allocation11 + $0x98] sm:$0xff] }
  0xca   :  { %758 = vmatpush.msrb.mxu3 %v645_v14  ;;  %721 = vmatpush.msrb.mxu1 %v632_v15  ;;  %v651_v13 = vld [vmem:[#allocation11 + $0x318] sm:$0xff]  ;;  %v566_v14 = vld [vmem:[#allocation11 + $0x70] sm:$0xff] }
  0xcb   :  { %739 = vmatpush.msrb.mxu2 %v577_v16  ;;  %702 = vmatpush.msrb.mxu0 %v564_v17  ;;  %v646_v15 = vld [vmem:[#allocation11 + $0x2f0] sm:$0xff]  ;;  %v567_v16 = vld [vmem:[#allocation11 + $0x78] sm:$0xff] }
  0xcc   :  { %759 = vmatpush.msrb.mxu3 %v641_v18  ;;  %722 = vmatpush.msrb.mxu1 %v628_v19  ;;  %v647_v17 = vld [vmem:[#allocation11 + $0x2f8] sm:$0xff]  ;;  %v562_v18 = vld [vmem:[#allocation11 + $0x50] sm:$0xff] }
  0xcd   :  { %740 = vmatpush.msrb.mxu2 %v573_v20  ;;  %703 = vmatpush.msrb.mxu0 %v560_v21  ;;  %v642_v19 = vld [vmem:[#allocation11 + $0x2d0] sm:$0xff]  ;;  %v563_v20 = vld [vmem:[#allocation11 + $0x58] sm:$0xff] }
  0xce   :  { %760 = vmatpush.msrb.mxu3 %v637_v22  ;;  %723 = vmatpush.msrb.mxu1 %v624_v36  ;;  %v643_v21 = vld [vmem:[#allocation11 + $0x2d8] sm:$0xff]  ;;  %v558_v22 = vld [vmem:[#allocation11 + $0x30] sm:$0xff] }
  0xcf   :  { %741 = vmatpush.msrb.mxu2 %v569_v23  ;;  %704 = vmatpush.msrb.mxu0 %v556_v24  ;;  %v638_v23 = vld [vmem:[#allocation11 + $0x2b0] sm:$0xff]  ;;  %v559_v24 = vld [vmem:[#allocation11 + $0x38] sm:$0xff] }
  0xd0   :  { %761 = vmatpush.msrb.mxu3 %v633_v25  ;;  %724 = vmatpush.msrb.mxu1 %v620_v40  ;;  %v639_v25 = vld [vmem:[#allocation11 + $0x2b8] sm:$0xff] }
  0xd1   :  { %742 = vmatpush.msrb.mxu2 %v565_v26  ;;  %705 = vmatpush.msrb.mxu0 %v552_v27  ;;  %v554_v26 = vld [vmem:[#allocation11 + $0x10] sm:$0xff]  ;;  %v623_v36 = vld [vmem:[#allocation11 + $0x238] sm:$0xff] }
  0xd2   :  { %762 = vmatpush.msrb.mxu3 %v629_v29  ;;  %725 = vmatpush.msrb.mxu1 %v616_v44  ;;  %v634_v27 = vld [vmem:[#allocation11 + $0x290] sm:$0xff]  ;;  %v635_v29 = vld [vmem:[#allocation11 + $0x298] sm:$0xff] }
  0xd3   :  { %770 = vmatpush.msra.mxu0 %v614_v28  ;;  %743 = vmatpush.msrb.mxu2 %v561_v30  ;;  %v555_v28 = vld [vmem:[#allocation11 + $0x18] sm:$0xff]  ;;  %v630_v30 = vld [vmem:[#allocation11 + $0x270] sm:$0xff] }
  0xd4   :  { %763 = vmatpush.msrb.mxu3 %v625_v37  ;;  %790 = vmatpush.msra.mxu1 %v678_v47 }
  0xd5   :  { %744 = vmatpush.msrb.mxu2 %v557_v31  ;;  %771 = vmatpush.msra.mxu0 %v610_v34  ;;  %v631_v31 = vld [vmem:[#allocation11 + $0x278] sm:$0xff] }
  0xd6   :  { %764 = vmatpush.msrb.mxu3 %v621_v41  ;;  %791 = vmatpush.msra.mxu1 %v674_v51  ;;  %v382_v34 = vld [vmem:[#allocation10] sm:$0x3] }
  0xd7   :  { %745 = vmatpush.msrb.mxu2 %v553_v32  ;;  %772 = vmatpush.msra.mxu0 %v606_v38  ;;  %v626_v32 = vld [vmem:[#allocation11 + $0x250] sm:$0xff]  ;;  %v384_v40 = vperm.slane %v382_v34, 0  ;;  %v385_v44 = vperm.slane %v382_v34, 1 }
  0xd8   :  { %765 = vmatpush.msrb.mxu3 %v617_v45  ;;  %792 = vmatpush.msra.mxu1 %v670_v55  ;;  %v618_v38 = vld [vmem:[#allocation11 + $0x210] sm:$0xff] }
  0xd9   :  { %810 = vmatpush.msra.mxu2 %v615_v33  ;;  %773 = vmatpush.msra.mxu0 %v602_v42  ;;  %v627_v33 = vld [vmem:[#allocation11 + $0x258] sm:$0xff] }
  0xda   :  { %830 = vmatpush.msra.mxu3 %v679_v49  ;;  %793 = vmatpush.msra.mxu1 %v666_v59 }
  0xdb   :  { %811 = vmatpush.msra.mxu2 %v611_v35  ;;  %774 = vmatpush.msra.mxu0 %v598_v46  ;;  %v622_v35 = vld [vmem:[#allocation11 + $0x230] sm:$0xff] }
  0xdc   :  { %831 = vmatpush.msra.mxu3 %v675_v53  ;;  %794 = vmatpush.msra.mxu1 %v662_v63  ;;  %v852_v63 = vld [vmem:[#allocation13 + $0x10] sm:$0xff] }
  0xdd   :  { %812 = vmatpush.msra.mxu2 %v607_v39  ;;  %775 = vmatpush.msra.mxu0 %v594_v50  ;;  %v619_v39 = vld [vmem:[#allocation11 + $0x218] sm:$0xff]  ;;  %862 = vst [vmem:[#allocation1 + $0x2] ss:$4 sm:$0xff] %v852_v63 }
  0xde   :  { %832 = vmatpush.msra.mxu3 %v671_v57  ;;  %795 = vmatpush.msra.mxu1 %v658_v3 }
  0xdf   :  { %813 = vmatpush.msra.mxu2 %v603_v43  ;;  %776 = vmatpush.msra.mxu0 %v590_v54 }
  0xe0   :  { %833 = vmatpush.msra.mxu3 %v667_v61  ;;  %796 = vmatpush.msra.mxu1 %v654_v7  ;;  %v850_v61 = vld [vmem:[#allocation13] sm:$0xff] }
  0xe1   :  { %814 = vmatpush.msra.mxu2 %v599_v48  ;;  %777 = vmatpush.msra.mxu0 %v586_v58  ;;  %858 = vst [vmem:[#allocation1] ss:$4 sm:$0xff] %v850_v61 }
  0xe2   :  { %834 = vmatpush.msra.mxu3 %v663_v1  ;;  %797 = vmatpush.msra.mxu1 %v650_v11 }
  0xe3   :  { %815 = vmatpush.msra.mxu2 %v595_v52  ;;  %778 = vmatpush.msra.mxu0 %v582_v62  ;;  %v851_v62 = vld [vmem:[#allocation13 + $0x8] sm:$0xff] }
  0xe4   :  { %835 = vmatpush.msra.mxu3 %v659_v5  ;;  %798 = vmatpush.msra.mxu1 %v646_v15  ;;  %860 = vst [vmem:[#allocation1 + $0x1] ss:$4 sm:$0xff] %v851_v62 }
  0xe5   :  { %816 = vmatpush.msra.mxu2 %v591_v56  ;;  %779 = vmatpush.msra.mxu0 %v578_v2 }
  0xe6   :  { %836 = vmatpush.msra.mxu3 %v655_v9  ;;  %799 = vmatpush.msra.mxu1 %v642_v19 }
  0xe7   :  { %817 = vmatpush.msra.mxu2 %v587_v60  ;;  %780 = vmatpush.msra.mxu0 %v574_v6 }
  0xe8   :  { %837 = vmatpush.msra.mxu3 %v651_v13  ;;  %800 = vmatpush.msra.mxu1 %v638_v23 }
  0xe9   :  { %818 = vmatpush.msra.mxu2 %v583_v0  ;;  %781 = vmatpush.msra.mxu0 %v570_v10  ;;  %v853_v0 = vld [vmem:[#allocation13 + $0x18] sm:$0xff] }
  0xea   :  { %838 = vmatpush.msra.mxu3 %v647_v17  ;;  %801 = vmatpush.msra.mxu1 %v634_v27  ;;  %864 = vst [vmem:[#allocation1 + $0x3] ss:$4 sm:$0xff] %v853_v0 }
  0xeb   :  { %819 = vmatpush.msra.mxu2 %v579_v4  ;;  %782 = vmatpush.msra.mxu0 %v566_v14  ;;  %v680_v4 = vld [vmem:[%s1265_s6] sm:$0xf] }
  0xec   :  { %839 = vmatpush.msra.mxu3 %v643_v21  ;;  %802 = vmatpush.msra.mxu1 %v630_v30  ;;  %v683_v5 = vperm.slane %v680_v4, 1  ;;  %v684_v6 = vperm.slane %v680_v4, 2  ;;  %v682_v10 = vperm.slane %v680_v4, 0  ;;  %v685_v15 = vperm.slane %v680_v4, 3 }
  0xed   :  { %820 = vmatpush.msra.mxu2 %v575_v8  ;;  %783 = vmatpush.msra.mxu0 %v562_v18 }
  0xee   :  { %840 = vmatpush.msra.mxu3 %v639_v25  ;;  %803 = vmatpush.msra.mxu1 %v626_v32 }
  0xef   :  { %821 = vmatpush.msra.mxu2 %v571_v12  ;;  %784 = vmatpush.msra.mxu0 %v558_v22 }
  0xf0   :  { %841 = vmatpush.msra.mxu3 %v635_v29  ;;  %804 = vmatpush.msra.mxu1 %v622_v35 }
  0xf1   :  { %822 = vmatpush.msra.mxu2 %v567_v16  ;;  %785 = vmatpush.msra.mxu0 %v554_v26  ;;  %v866_v14 = vld.sshfl [vmem:[#allocation1 + $0x8] sm:$0xff pattern:$0x73625140]  ;;  %v865_v25 = vld.sshfl [vmem:[#allocation1] sm:$0xff pattern:$0x73625140] }
  0xf2   :  { %842 = vmatpush.msra.mxu3 %v631_v31  ;;  %805 = vmatpush.msra.mxu1 %v618_v38 }
  0xf3   :  { %823 = vmatpush.msra.mxu2 %v563_v20  ;;  %v867_v20 = vld.sshfl [vmem:[#allocation1 + $0x10] sm:$0xff pattern:$0x73625140] }
  0xf4   :  { %843 = vmatpush.msra.mxu3 %v627_v33 }
  0xf5   :  { %824 = vmatpush.msra.mxu2 %v559_v24  ;;  %v868_v24 = vld.sshfl [vmem:[#allocation1 + $0x18] sm:$0xff pattern:$0x73625140] }
  0xf6   :  { %844 = vmatpush.msra.mxu3 %v623_v36 }
  0xf7   :  { %825 = vmatpush.msra.mxu2 %v555_v28 }
  0xf8   :  { %845 = vmatpush.msra.mxu3 %v619_v39 }
 0x12c   :  { %v405_v37 = vpop.f32.mrf.mxu0  ;;  %v425_v42 = vpop.f32.mrf.mxu1 }
 0x12d   :  { %v406_v41 = vadd.f32 %v405_v37, %v384_v40 }
 0x12f   :  { %v426_v43 = vadd.f32 %v425_v42, %v406_v41 }
 0x134   :  { %v485_v45 = vpop.f32.mrf.mxu0  ;;  %v505_v52 = vpop.f32.mrf.mxu1 }
 0x135   :  { %v486_v49 = vadd.f32 %v485_v45, %v385_v44 }
 0x137   :  { %v506_v53 = vadd.f32 %v505_v52, %v486_v49 }
 0x139   :  { %v445_v46 = vpop.f32.mrf.mxu2  ;;  %v465_v47 = vpop.f32.mrf.mxu3 }
 0x13a   :  { %v446_v48 = vadd.f32 %v445_v46, %v426_v43 }
 0x13c   :  { %v466_v50 = vadd.f32 %v465_v47, %v446_v48 }
 0x13e   :  { %v548_v51 = vmul.f32 0.2, %v466_v50 }
 0x140   :  { %v550_v54 = vmax.f32 %v466_v50, %v548_v51 }
 0x141   :  { %v525_v55 = vpop.f32.mrf.mxu2  ;;  %v545_v57 = vpop.f32.mrf.mxu3 }
 0x142   :  { %v526_v56 = vadd.f32 %v525_v55, %v506_v53  ;;  %706 = vmatmul.f32.vlgmr.msrb.gmra.mxu0 %v550_v54  ;;  %746 = vmatmul.f32.vlgmr.msrb.gmra.mxu2 %v550_v54 }
 0x144   :  { %v546_v58 = vadd.f32 %v545_v57, %v526_v56 }
 0x146   :  { %v549_v59 = vmul.f32 0.2, %v546_v58 }
 0x148   :  { %v551_v60 = vmax.f32 %v546_v58, %v549_v59 }
 0x14a   :  { %726 = vmatmul.f32.vlgmr.msrb.gmra.mxu1 %v551_v60  ;;  %766 = vmatmul.f32.vlgmr.msrb.gmra.mxu3 %v551_v60 }
 0x14b   :  { %786 = vmatmul.f32.vlgmr.msra.gmra.mxu0 %v550_v54  ;;  %826 = vmatmul.f32.vlgmr.msra.gmra.mxu2 %v550_v54 }
 0x152   :  { %806 = vmatmul.f32.vlgmr.msra.gmra.mxu1 %v551_v60  ;;  %846 = vmatmul.f32.vlgmr.msra.gmra.mxu3 %v551_v60 }
 0x1bf   :  { %v707_v1 = vpop.f32.mrf.mxu0 }
 0x1c0   :  { %v708_v18 = vadd.f32 %v707_v1, %v682_v10 }
 0x1c5   :  { %v747_v2 = vpop.f32.mrf.mxu2 }
 0x1c6   :  { %v748_v7 = vadd.f32 %v747_v2, %v683_v5 }
 0x1c7   :  { %v727_v3 = vpop.f32.mrf.mxu1 }
 0x1c8   :  { %v787_v8 = vpop.f32.mrf.mxu0  ;;  %v728_v22 = vadd.f32 %v727_v3, %v708_v18 }
 0x1c9   :  { %v788_v13 = vadd.f32 %v787_v8, %v684_v6 }
 0x1ca   :  { %v873_v30 = vadd.f32 %v865_v25, %v728_v22 }
 0x1cd   :  { %v767_v9 = vpop.f32.mrf.mxu3 }
 0x1ce   :  { %v768_v11 = vadd.f32 %v767_v9, %v748_v7  ;;  %v827_v16 = vpop.f32.mrf.mxu2 }
 0x1cf   :  { %v807_v12 = vpop.f32.mrf.mxu1  ;;  %v828_v21 = vadd.f32 %v827_v16, %v685_v15 }
 0x1d0   :  { %v808_v17 = vadd.f32 %v807_v12, %v788_v13  ;;  %v874_v19 = vadd.f32 %v866_v14, %v768_v11 }
 0x1d2   :  { %v875_v26 = vadd.f32 %v867_v20, %v808_v17  ;;  %v881_v28 = vrot.slane %v874_v19, 6 }
 0x1d4   :  { %v882_v31 = vrot.slane %v875_v26, 4  ;;  %v885_v33 = vsel %vm884_vm1, %v873_v30, %v881_v28  ;;  %v891_v34 = vsel %vm890_vm3, %v873_v30, %v881_v28  ;;  %v897_v35 = vsel %vm886_vm2, %v873_v30, %v881_v28 }
 0x1d5   :  { %v847_v23 = vpop.f32.mrf.mxu3  ;;  %v901_v36 = vsel %vm892_vm4, %v881_v28, %v873_v30 }
 0x1d6   :  { %v848_v27 = vadd.f32 %v847_v23, %v828_v21 }
 0x1d8   :  { %v876_v29 = vadd.f32 %v868_v24, %v848_v27 }
 0x1da   :  { %v883_v32 = vrot.slane %v876_v29, 2 }
 0x1dc   :  { %v887_v37 = vsel %vm886_vm2, %v882_v31, %v883_v32  ;;  %v893_v38 = vsel %vm892_vm4, %v883_v32, %v882_v31  ;;  %v898_v39 = vsel %vm884_vm1, %v882_v31, %v883_v32  ;;  %v902_v40 = vsel %vm890_vm3, %v882_v31, %v883_v32 }
 0x1dd   :  { %v889_v41 = vsel %vm888_vm5, %v885_v33, %v887_v37  ;;  %v895_v42 = vsel %vm894_vm6, %v891_v34, %v893_v38  ;;  %v899_v43 = vsel %vm888_vm5, %v898_v39, %v897_v35  ;;  %v903_v44 = vsel %vm894_vm6, %v902_v40, %v901_v36 }
 0x1de   :  { %v896_v45 = vrot.slane %v895_v42, 2  ;;  %v900_v46 = vrot.slane %v899_v43, 4  ;;  %v904_v47 = vrot.slane %v903_v44, 6  ;;  %909 = vst [vmem:[#allocation14] sm:$0xff] %v889_v41 }
 0x1e0   :  { %910 = vst [vmem:[#allocation14 + $0x8] sm:$0xff] %v896_v45 }
 0x1e1   :  { %911 = vst [vmem:[#allocation14 + $0x10] sm:$0xff] %v900_v46 }
 0x1e2   :  { %912 = vst [vmem:[#allocation14 + $0x18] sm:$0xff] %v904_v47 }
 0x1e3   :  { %916 = vsyncadd [#allocation4], 384  ;;  %s919_s20 = sshll.u32 %s1267_s8, 4  ;;  %s1170_s21 = smov [#allocation14]   ;;  %s920_s20 = int_to_ptr.hbm [resolvable:$true] %s919_s20 }
 0x1e4   :  { %s917_s3 = sshll.u32 %s1170_s21, 4  ;;  %s918_s3 = int_to_ptr.vmem [resolvable:$true] %s917_s3 }
 0x1e5   :  { %925 = dma.vmem_to_hbm [thread:$0]  %s918_s3, 128, %s920_s20, [#allocation4], %s1168_s5, %s1168_s5, %s1169_s19  }
 0x1e6   :  { %1154 = dma.done.wait [#allocation4], 512  }
 0x1e7   :  { %1155 = vsyncadd [#allocation4], 4294966784 }
 0x1e8   :  { %930 = vsyncpa [#allocation3], 1 }
 0x1e9   :  { %931 = vsyncpa [#allocation6], 1 }
 0x1ea   :  { %932 = vsyncpa [#allocation9], 1 }
 0x1eb   :  { %933 = vsyncpa [#allocation12], 1 }
 0x1ec   :  { %934 = vsyncpa [#allocation4], 1 }

</bundles_post_ra>
